<compile_context>
chip_gen: v5e
topology: v5e:2x2
jax: 0.10.0
libtpu: 0.0.40
codegen_flags: <defaults>
</compile_context>

<pallas_src>
import functools

import jax
import jax.numpy as jnp
from jax.experimental import pallas as pl
from jax.experimental.pallas import tpu as pltpu


# ----------------------------------------------------------------------------
# Fused Pallas kernel (one batch image per grid step)
# ----------------------------------------------------------------------------
def _lr_res_block_kernel(x_ref, w1p_ref, b1p_ref,
                         kr1_ref, br1p_ref, kr2_ref, br2p_ref,
                         gmat_ref, bnb_ref, w2s_ref, b2_ref,
                         k3w_ref, k3y_ref, mz_ref, b3p_ref, psh_ref,
                         o_ref,
                         cpad_ref,
                         *, H, W, C, C2):
    f32 = jnp.float32
    bf16 = jnp.bfloat16
    WC = W * C
    WC2 = W * C2

    # ---- conv101_2to1: 1x1 conv (C -> C/2), folded BN, ReLU -----------------
    x = x_ref[0]                                                   # (H, W*C) bf16
    x1 = jnp.dot(x, w1p_ref[...], preferred_element_type=f32)
    x1 = jnp.maximum(x1 + b1p_ref[...], 0.0)                       # (H, W*C2) f32

    # Zero-row-padded scratch shared by maxpool + every 3x3 conv.
    cpad_ref[...] = jnp.zeros((H + 2, WC2), f32)
    cpad_ref[1:H + 1, :] = x1

    def conv3x3(kref):
        # sum over the three row offsets of the Toeplitz-packed 3x3 conv.
        acc = jnp.dot(cpad_ref[0:H, :].astype(bf16), kref[0],
                      preferred_element_type=f32)
        acc = acc + jnp.dot(cpad_ref[1:H + 1, :].astype(bf16), kref[1],
                            preferred_element_type=f32)
        acc = acc + jnp.dot(cpad_ref[2:H + 2, :].astype(bf16), kref[2],
                            preferred_element_type=f32)
        return acc

    # ---- max_pooling: MaxPool2d(3, 1, 1) ------------------------------------
    # x1 >= 0 (post-ReLU), so zero padding is equivalent to -inf padding.
    wpool = x1
    for dy in range(3):
        r = cpad_ref[dy:dy + H, :]                                  # (H, W*C2) f32
        rb = r.astype(bf16)
        left = jnp.dot(rb, psh_ref[0], preferred_element_type=f32)   # shift w -> w-1
        right = jnp.dot(rb, psh_ref[1], preferred_element_type=f32)  # shift w -> w+1
        wpool = jnp.maximum(wpool,
                            jnp.maximum(r, jnp.maximum(left, right)))

    # ---- z branch: GAP -> BN -> 1x1 conv, reduced to per-row correction -----
    gsum = jnp.dot(x1.astype(bf16), gmat_ref[...],
                   preferred_element_type=f32)                      # (H, C2)
    zb = jnp.sum(gsum, axis=0, keepdims=True) + bnb_ref[...]        # (1, C2)
    zb8 = jnp.broadcast_to(zb, (8, C2)).astype(bf16)                # avoid M=1 dots
    z2 = jnp.maximum(jnp.dot(zb8, w2s_ref[...],
                             preferred_element_type=f32) + b2_ref[...], 0.0)
    z2 = z2.astype(bf16)                                            # (8, C2)
    z_top = jnp.dot(z2, mz_ref[0], preferred_element_type=f32)[0:1]  # (1, W*C)
    z_mid = jnp.dot(z2, mz_ref[1], preferred_element_type=f32)[0:1]
    z_bot = jnp.dot(z2, mz_ref[2], preferred_element_type=f32)[0:1]
    rows = jax.lax.broadcasted_iota(jnp.int32, (H, WC), 0)
    z_corr = jnp.where(rows == 0, jnp.broadcast_to(z_top, (H, WC)),
                       jnp.where(rows == H - 1, jnp.broadcast_to(z_bot, (H, WC)),
                                 jnp.broadcast_to(z_mid, (H, WC))))

    # ---- basic_res: y = x1 + conv2(conv1(x1)), 3x3 convs + folded BN + ReLU -
    # TODO(synk): BasicResBlock assumed as x + conv2(conv1(x)) with ReLU on both
    # convs and no ReLU after the add; verify against the real wnet definition.
    t = jnp.maximum(conv3x3(kr1_ref) + br1p_ref[...], 0.0)
    cpad_ref[1:H + 1, :] = t
    u = jnp.maximum(conv3x3(kr2_ref) + br2p_ref[...], 0.0)
    y = x1 + u

    # ---- conv311 over cat([w, y, z]): split into w/y dots + z correction ----
    cpad_ref[1:H + 1, :] = wpool
    acc = conv3x3(k3w_ref)
    cpad_ref[1:H + 1, :] = y
    acc = acc + conv3x3(k3y_ref)
    out = jnp.maximum(acc + z_corr + b3p_ref[...], 0.0)             # (H, W*C)
    o_ref[0] = out.astype(o_ref.dtype)


# ----------------------------------------------------------------------------
# Host-side packing: fold BN scales, build lane-packed / Toeplitz weights
# ----------------------------------------------------------------------------
def pack_params(p, H, W):
    f32, bf16 = jnp.float32, jnp.bfloat16
    C, C2 = p["w1"].shape

    def conv3x3_mats(k, scale):
        # k: (3, 3, Cin, Cout) -> (3, W*Cin, W*Cout); W-border zero pad folded in.
        ks = (k * scale[None, None, None, :]).astype(f32)
        mats = []
        for dy in range(3):
            m = jnp.zeros((W * ks.shape[2], W * ks.shape[3]), f32)
            for dx in range(3):
                m = m + jnp.kron(jnp.eye(W, W, k=1 - dx, dtype=f32), ks[dy, dx])
            mats.append(m)
        return jnp.stack(mats).astype(bf16)

    q = {}
    q["w1p"] = jnp.kron(jnp.eye(W, dtype=f32),
                        p["w1"] * p["s1"][None, :]).astype(bf16)       # (W*C, W*C2)
    q["b1p"] = jnp.tile(p["b1"], W).reshape(1, W * C2).astype(f32)

    q["kr1"] = conv3x3_mats(p["wr1"], p["sr1"])
    q["br1p"] = jnp.tile(p["br1"], W).reshape(1, W * C2).astype(f32)
    q["kr2"] = conv3x3_mats(p["wr2"], p["sr2"])
    q["br2p"] = jnp.tile(p["br2"], W).reshape(1, W * C2).astype(f32)

    # GAP matrix with BN scale and 1/(H*W) folded in: (W*C2, C2)
    q["gmat"] = jnp.kron(jnp.ones((W, 1), f32),
                         jnp.diag(p["bn_s"]) / float(H * W)).astype(bf16)
    q["bnb"] = p["bn_b"].reshape(1, C2).astype(f32)
    q["w2s"] = (p["w2"] * p["s2"][None, :]).astype(bf16)
    q["b2"] = p["b2"].reshape(1, C2).astype(f32)

    # Final 3x3 conv, split by input channel group: cat order is (w | y | z).
    k3 = p["w3"]
    q["k3w"] = conv3x3_mats(k3[:, :, 0:C2, :], p["s3"])                # (3, W*C2, W*C)
    q["k3y"] = conv3x3_mats(k3[:, :, C2:2 * C2, :], p["s3"])

    # z group: spatially constant input -> per-row reduction matrices (C2, W*C)
    k3z = (k3[:, :, 2 * C2:, :] * p["s3"][None, None, None, :]).astype(f32)
    wmask = {
        0: jnp.concatenate([jnp.zeros((1, 1), f32), jnp.ones((1, W - 1), f32)], 1),
        1: jnp.ones((1, W), f32),
        2: jnp.concatenate([jnp.ones((1, W - 1), f32), jnp.zeros((1, 1), f32)], 1),
    }

    def mz_dy(dy):
        m = jnp.zeros((C2, W * C), f32)
        for dx in range(3):
            m = m + jnp.kron(wmask[dx], k3z[dy, dx])
        return m

    mz0, mz1, mz2 = mz_dy(0), mz_dy(1), mz_dy(2)
    q["mz"] = jnp.stack([mz1 + mz2, mz0 + mz1 + mz2, mz0 + mz1]).astype(bf16)
    q["b3p"] = jnp.tile(p["b3"], W).reshape(1, W * C).astype(f32)

    # 0/1 lane-shift matrices for the max-pool (w-1, w+1 neighbours).
    q["psh"] = jnp.stack([
        jnp.kron(jnp.eye(W, W, k=1, dtype=f32), jnp.eye(C2, dtype=f32)),
        jnp.kron(jnp.eye(W, W, k=-1, dtype=f32), jnp.eye(C2, dtype=f32)),
    ]).astype(bf16)
    return q


# ----------------------------------------------------------------------------
# LRResBlock forward
# ----------------------------------------------------------------------------
def lr_res_block_forward(x_nchw, packed):
    N, C, H, W = x_nchw.shape
    assert C % 2 == 0 and H >= 2 and W >= 2
    C2 = C // 2
    WC, WC2 = W * C, W * C2

    # NCHW -> lane-packed (N, H, W*C), bf16 for MXU + halved HBM bytes.
    x = jnp.transpose(x_nchw, (0, 2, 3, 1)).reshape(N, H, WC).astype(jnp.bfloat16)

    def const_spec(a):
        return pl.BlockSpec(a.shape, lambda b, _z=(0,) * a.ndim: _z)

    order = ["w1p", "b1p", "kr1", "br1p", "kr2", "br2p",
             "gmat", "bnb", "w2s", "b2", "k3w", "k3y", "mz", "b3p", "psh"]
    weights = [packed[k] for k in order]

    out = pl.pallas_call(
        functools.partial(_lr_res_block_kernel, H=H, W=W, C=C, C2=C2),
        out_shape=jax.ShapeDtypeStruct((N, H, WC), jnp.float32),
        grid=(N,),
        in_specs=[pl.BlockSpec((1, H, WC), lambda b: (b, 0, 0))]
                 + [const_spec(a) for a in weights],
        out_specs=pl.BlockSpec((1, H, WC), lambda b: (b, 0, 0)),
        scratch_shapes=[pltpu.VMEM((H + 2, WC2), jnp.float32)],
        compiler_params=pltpu.CompilerParams(
            dimension_semantics=("parallel",)),
    )(x, *weights)
    # TODO(synk): for very large H*W, switch to a row-tiled two-pass variant
    # (GAP first, then convs); one image per grid step is ample VMEM here.

    return jnp.transpose(out.reshape(N, H, W, C), (0, 3, 1, 2))


# ----------------------------------------------------------------------------
# Deterministic synthetic parameters (raw conv weights + eval-mode BN affines)
# ----------------------------------------------------------------------------
def init_params(key, channel):
    C, C2 = channel, channel // 2
    ks = jax.random.split(key, 11)

    def wgt(k, shape):
        return jax.random.normal(k, shape, jnp.float32) * 0.3

    def affine(k, c):  # folded eval-mode BatchNorm (scale, bias)
        k1, k2 = jax.random.split(k)
        return (jax.random.uniform(k1, (c,), jnp.float32, 0.5, 1.5),
                jax.random.normal(k2, (c,), jnp.float32) * 0.1)

    p = {}
    p["w1"] = wgt(ks[0], (C, C2));            p["s1"], p["b1"] = affine(ks[1], C2)
    p["wr1"] = wgt(ks[2], (3, 3, C2, C2));    p["sr1"], p["br1"] = affine(ks[3], C2)
    p["wr2"] = wgt(ks[4], (3, 3, C2, C2));    p["sr2"], p["br2"] = affine(ks[5], C2)
    p["bn_s"], p["bn_b"] = affine(ks[6], C2)
    p["w2"] = wgt(ks[7], (C2, C2));           p["s2"], p["b2"] = affine(ks[8], C2)
    p["w3"] = wgt(ks[9], (3, 3, 3 * C2, C));  p["s3"], p["b3"] = affine(ks[10], C)
    return p


if __name__ == "__main__":
    key = jax.random.PRNGKey(0)
    k_x, k_p = jax.random.split(key)
    N, C, H, W = 2, 8, 16, 16                 # channel=8 -> internal C/2 = 4
    x = jax.random.normal(k_x, (N, C, H, W), jnp.float32)
    params = init_params(k_p, C)
    packed = pack_params(params, H, W)

    out = jax.jit(lr_res_block_forward)(x, packed)
    out = jax.block_until_ready(out)
    assert out.shape == (N, C, H, W) and out.dtype == jnp.float32
    print("KERNEL_OK")
</pallas_src>

<mosaic_0001>
module attributes {stable_mosaic.version = 11 : i64} {
  func.func @_lr_res_block_kernel(%arg0: i32, %arg1: memref<1x16x128xbf16, #tpu.memory_space<vmem>>, %arg2: memref<128x64xbf16, #tpu.memory_space<vmem>>, %arg3: memref<1x64xf32, #tpu.memory_space<vmem>>, %arg4: memref<3x64x64xbf16, #tpu.memory_space<vmem>>, %arg5: memref<1x64xf32, #tpu.memory_space<vmem>>, %arg6: memref<3x64x64xbf16, #tpu.memory_space<vmem>>, %arg7: memref<1x64xf32, #tpu.memory_space<vmem>>, %arg8: memref<64x4xbf16, #tpu.memory_space<vmem>>, %arg9: memref<1x4xf32, #tpu.memory_space<vmem>>, %arg10: memref<4x4xbf16, #tpu.memory_space<vmem>>, %arg11: memref<1x4xf32, #tpu.memory_space<vmem>>, %arg12: memref<3x64x128xbf16, #tpu.memory_space<vmem>>, %arg13: memref<3x64x128xbf16, #tpu.memory_space<vmem>>, %arg14: memref<3x4x128xbf16, #tpu.memory_space<vmem>>, %arg15: memref<1x128xf32, #tpu.memory_space<vmem>>, %arg16: memref<2x64x64xbf16, #tpu.memory_space<vmem>>, %arg17: memref<1x16x128xf32, #tpu.memory_space<vmem>>, %arg18: memref<18x64xf32, #tpu.memory_space<vmem>>) attributes {dimension_semantics = [#tpu.dimension_semantics<parallel>], iteration_bounds = array<i64: 2>, scalar_prefetch = 0 : i64, scratch_operands = 1 : i64, tpu.core_type = #tpu.core_type<tc>, window_params = [{transform_indices = @transform_0, window_bounds = array<i64: 1, 16, 128>}, {pipeline_mode = #tpu.pipeline_mode<synchronous>, transform_indices = @transform_1, window_bounds = array<i64: 128, 64>}, {pipeline_mode = #tpu.pipeline_mode<synchronous>, transform_indices = @transform_2, window_bounds = array<i64: 1, 64>}, {pipeline_mode = #tpu.pipeline_mode<synchronous>, transform_indices = @transform_3, window_bounds = array<i64: 3, 64, 64>}, {pipeline_mode = #tpu.pipeline_mode<synchronous>, transform_indices = @transform_4, window_bounds = array<i64: 1, 64>}, {pipeline_mode = #tpu.pipeline_mode<synchronous>, transform_indices = @transform_5, window_bounds = array<i64: 3, 64, 64>}, {pipeline_mode = #tpu.pipeline_mode<synchronous>, transform_indices = @transform_6, window_bounds = array<i64: 1, 64>}, {pipeline_mode = #tpu.pipeline_mode<synchronous>, transform_indices = @transform_7, window_bounds = array<i64: 64, 4>}, {pipeline_mode = #tpu.pipeline_mode<synchronous>, transform_indices = @transform_8, window_bounds = array<i64: 1, 4>}, {pipeline_mode = #tpu.pipeline_mode<synchronous>, transform_indices = @transform_9, window_bounds = array<i64: 4, 4>}, {pipeline_mode = #tpu.pipeline_mode<synchronous>, transform_indices = @transform_10, window_bounds = array<i64: 1, 4>}, {pipeline_mode = #tpu.pipeline_mode<synchronous>, transform_indices = @transform_11, window_bounds = array<i64: 3, 64, 128>}, {pipeline_mode = #tpu.pipeline_mode<synchronous>, transform_indices = @transform_12, window_bounds = array<i64: 3, 64, 128>}, {pipeline_mode = #tpu.pipeline_mode<synchronous>, transform_indices = @transform_13, window_bounds = array<i64: 3, 4, 128>}, {pipeline_mode = #tpu.pipeline_mode<synchronous>, transform_indices = @transform_14, window_bounds = array<i64: 1, 128>}, {pipeline_mode = #tpu.pipeline_mode<synchronous>, transform_indices = @transform_15, window_bounds = array<i64: 2, 64, 64>}, {transform_indices = @transform_16, window_bounds = array<i64: 1, 16, 128>}]} {
    %c0 = arith.constant 0 : index
    %c0_0 = arith.constant 0 : index
    %c0_1 = arith.constant 0 : index
    %0 = vector.load %arg1[%c0, %c0_0, %c0_1] : memref<1x16x128xbf16, #tpu.memory_space<vmem>>, vector<1x16x128xbf16>
    %1 = vector.shape_cast %0 : vector<1x16x128xbf16> to vector<16x128xbf16>
    %c0_2 = arith.constant 0 : index
    %c0_3 = arith.constant 0 : index
    %2 = vector.load %arg2[%c0_2, %c0_3] : memref<128x64xbf16, #tpu.memory_space<vmem>>, vector<128x64xbf16>
    %cst = arith.constant dense<0.000000e+00> : vector<16x64xf32>
    %3 = tpu.matmul %1, %2, %cst {dimension_numbers = #tpu.dot_dimension_numbers<[1], [0], [0], [1], [0, 0, 1, 1], [], []>} : vector<16x128xbf16>, vector<128x64xbf16>, vector<16x64xf32> -> vector<16x64xf32>
    %c0_4 = arith.constant 0 : index
    %c0_5 = arith.constant 0 : index
    %4 = vector.load %arg3[%c0_4, %c0_5] : memref<1x64xf32, #tpu.memory_space<vmem>>, vector<1x64xf32>
    %5 = vector.broadcast %4 : vector<1x64xf32> to vector<16x64xf32>
    %6 = arith.addf %3, %5 : vector<16x64xf32>
    %cst_6 = arith.constant 0.000000e+00 : f32
    %7 = vector.broadcast %cst_6 : f32 to vector<16x64xf32>
    %8 = arith.maximumf %6, %7 : vector<16x64xf32>
    %cst_7 = arith.constant 0.000000e+00 : f32
    %9 = vector.broadcast %cst_7 : f32 to vector<18x64xf32>
    %c0_8 = arith.constant 0 : index
    %c0_9 = arith.constant 0 : index
    %10 = vector.load %arg18[%c0_8, %c0_9] : memref<18x64xf32, #tpu.memory_space<vmem>>, vector<18x64xf32>
    tpu.vector_store %arg18[%c0_8, %c0_9], %9 {strides = array<i32>} : memref<18x64xf32, #tpu.memory_space<vmem>>, vector<18x64xf32>,
    %c1 = arith.constant 1 : index
    %c0_10 = arith.constant 0 : index
    %11 = vector.load %arg18[%c1, %c0_10] : memref<18x64xf32, #tpu.memory_space<vmem>>, vector<16x64xf32>
    tpu.vector_store %arg18[%c1, %c0_10], %8 {strides = array<i32>} : memref<18x64xf32, #tpu.memory_space<vmem>>, vector<16x64xf32>,
    %c0_11 = arith.constant 0 : index
    %c0_12 = arith.constant 0 : index
    %12 = vector.load %arg18[%c0_11, %c0_12] : memref<18x64xf32, #tpu.memory_space<vmem>>, vector<16x64xf32>
    %13 = arith.truncf %12 : vector<16x64xf32> to vector<16x64xbf16>
    %c0_13 = arith.constant 0 : index
    %c0_14 = arith.constant 0 : index
    %c0_15 = arith.constant 0 : index
    %14 = vector.load %arg16[%c0_13, %c0_14, %c0_15] : memref<2x64x64xbf16, #tpu.memory_space<vmem>>, vector<1x64x64xbf16>
    %15 = vector.shape_cast %14 : vector<1x64x64xbf16> to vector<64x64xbf16>
    %cst_16 = arith.constant dense<0.000000e+00> : vector<16x64xf32>
    %16 = tpu.matmul %13, %15, %cst_16 {dimension_numbers = #tpu.dot_dimension_numbers<[1], [0], [0], [1], [0, 0, 1, 1], [], []>} : vector<16x64xbf16>, vector<64x64xbf16>, vector<16x64xf32> -> vector<16x64xf32>
    %c1_17 = arith.constant 1 : index
    %c0_18 = arith.constant 0 : index
    %c0_19 = arith.constant 0 : index
    %17 = vector.load %arg16[%c1_17, %c0_18, %c0_19] : memref<2x64x64xbf16, #tpu.memory_space<vmem>>, vector<1x64x64xbf16>
    %18 = vector.shape_cast %17 : vector<1x64x64xbf16> to vector<64x64xbf16>
    %cst_20 = arith.constant dense<0.000000e+00> : vector<16x64xf32>
    %19 = tpu.matmul %13, %18, %cst_20 {dimension_numbers = #tpu.dot_dimension_numbers<[1], [0], [0], [1], [0, 0, 1, 1], [], []>} : vector<16x64xbf16>, vector<64x64xbf16>, vector<16x64xf32> -> vector<16x64xf32>
    %20 = arith.maximumf %16, %19 : vector<16x64xf32>
    %21 = arith.maximumf %12, %20 : vector<16x64xf32>
    %22 = arith.maximumf %8, %21 : vector<16x64xf32>
    %c1_21 = arith.constant 1 : index
    %c0_22 = arith.constant 0 : index
    %23 = vector.load %arg18[%c1_21, %c0_22] : memref<18x64xf32, #tpu.memory_space<vmem>>, vector<16x64xf32>
    %24 = arith.truncf %23 : vector<16x64xf32> to vector<16x64xbf16>
    %c0_23 = arith.constant 0 : index
    %c0_24 = arith.constant 0 : index
    %c0_25 = arith.constant 0 : index
    %25 = vector.load %arg16[%c0_23, %c0_24, %c0_25] : memref<2x64x64xbf16, #tpu.memory_space<vmem>>, vector<1x64x64xbf16>
    %26 = vector.shape_cast %25 : vector<1x64x64xbf16> to vector<64x64xbf16>
    %cst_26 = arith.constant dense<0.000000e+00> : vector<16x64xf32>
    %27 = tpu.matmul %24, %26, %cst_26 {dimension_numbers = #tpu.dot_dimension_numbers<[1], [0], [0], [1], [0, 0, 1, 1], [], []>} : vector<16x64xbf16>, vector<64x64xbf16>, vector<16x64xf32> -> vector<16x64xf32>
    %c1_27 = arith.constant 1 : index
    %c0_28 = arith.constant 0 : index
    %c0_29 = arith.constant 0 : index
    %28 = vector.load %arg16[%c1_27, %c0_28, %c0_29] : memref<2x64x64xbf16, #tpu.memory_space<vmem>>, vector<1x64x64xbf16>
    %29 = vector.shape_cast %28 : vector<1x64x64xbf16> to vector<64x64xbf16>
    %cst_30 = arith.constant dense<0.000000e+00> : vector<16x64xf32>
    %30 = tpu.matmul %24, %29, %cst_30 {dimension_numbers = #tpu.dot_dimension_numbers<[1], [0], [0], [1], [0, 0, 1, 1], [], []>} : vector<16x64xbf16>, vector<64x64xbf16>, vector<16x64xf32> -> vector<16x64xf32>
    %31 = arith.maximumf %27, %30 : vector<16x64xf32>
    %32 = arith.maximumf %23, %31 : vector<16x64xf32>
    %33 = arith.maximumf %22, %32 : vector<16x64xf32>
    %c2 = arith.constant 2 : index
    %c0_31 = arith.constant 0 : index
    %34 = vector.load %arg18[%c2, %c0_31] : memref<18x64xf32, #tpu.memory_space<vmem>>, vector<16x64xf32>
    %35 = arith.truncf %34 : vector<16x64xf32> to vector<16x64xbf16>
    %c0_32 = arith.constant 0 : index
    %c0_33 = arith.constant 0 : index
    %c0_34 = arith.constant 0 : index
    %36 = vector.load %arg16[%c0_32, %c0_33, %c0_34] : memref<2x64x64xbf16, #tpu.memory_space<vmem>>, vector<1x64x64xbf16>
    %37 = vector.shape_cast %36 : vector<1x64x64xbf16> to vector<64x64xbf16>
    %cst_35 = arith.constant dense<0.000000e+00> : vector<16x64xf32>
    %38 = tpu.matmul %35, %37, %cst_35 {dimension_numbers = #tpu.dot_dimension_numbers<[1], [0], [0], [1], [0, 0, 1, 1], [], []>} : vector<16x64xbf16>, vector<64x64xbf16>, vector<16x64xf32> -> vector<16x64xf32>
    %c1_36 = arith.constant 1 : index
    %c0_37 = arith.constant 0 : index
    %c0_38 = arith.constant 0 : index
    %39 = vector.load %arg16[%c1_36, %c0_37, %c0_38] : memref<2x64x64xbf16, #tpu.memory_space<vmem>>, vector<1x64x64xbf16>
    %40 = vector.shape_cast %39 : vector<1x64x64xbf16> to vector<64x64xbf16>
    %cst_39 = arith.constant dense<0.000000e+00> : vector<16x64xf32>
    %41 = tpu.matmul %35, %40, %cst_39 {dimension_numbers = #tpu.dot_dimension_numbers<[1], [0], [0], [1], [0, 0, 1, 1], [], []>} : vector<16x64xbf16>, vector<64x64xbf16>, vector<16x64xf32> -> vector<16x64xf32>
    %42 = arith.maximumf %38, %41 : vector<16x64xf32>
    %43 = arith.maximumf %34, %42 : vector<16x64xf32>
    %44 = arith.maximumf %33, %43 : vector<16x64xf32>
    %45 = arith.truncf %8 : vector<16x64xf32> to vector<16x64xbf16>
    %c0_40 = arith.constant 0 : index
    %c0_41 = arith.constant 0 : index
    %46 = vector.load %arg8[%c0_40, %c0_41] : memref<64x4xbf16, #tpu.memory_space<vmem>>, vector<64x4xbf16>
    %cst_42 = arith.constant dense<0.000000e+00> : vector<16x4xf32>
    %47 = tpu.matmul %45, %46, %cst_42 {dimension_numbers = #tpu.dot_dimension_numbers<[1], [0], [0], [1], [0, 0, 1, 1], [], []>} : vector<16x64xbf16>, vector<64x4xbf16>, vector<16x4xf32> -> vector<16x4xf32>
    %cst_43 = arith.constant dense<0.000000e+00> : vector<4xf32>
    %48 = vector.multi_reduction <add>, %47, %cst_43 [0] : vector<16x4xf32> to vector<4xf32>
    %49 = vector.shape_cast %48 : vector<4xf32> to vector<1x4xf32>
    %c0_44 = arith.constant 0 : index
    %c0_45 = arith.constant 0 : index
    %50 = vector.load %arg9[%c0_44, %c0_45] : memref<1x4xf32, #tpu.memory_space<vmem>>, vector<1x4xf32>
    %51 = arith.addf %49, %50 : vector<1x4xf32>
    %52 = vector.shape_cast %51 : vector<1x4xf32> to vector<1x4xf32>
    %53 = vector.broadcast %52 : vector<1x4xf32> to vector<8x4xf32>
    %54 = arith.truncf %53 : vector<8x4xf32> to vector<8x4xbf16>
    %c0_46 = arith.constant 0 : index
    %c0_47 = arith.constant 0 : index
    %55 = vector.load %arg10[%c0_46, %c0_47] : memref<4x4xbf16, #tpu.memory_space<vmem>>, vector<4x4xbf16>
    %cst_48 = arith.constant dense<0.000000e+00> : vector<8x4xf32>
    %56 = tpu.matmul %54, %55, %cst_48 {dimension_numbers = #tpu.dot_dimension_numbers<[1], [0], [0], [1], [0, 0, 1, 1], [], []>} : vector<8x4xbf16>, vector<4x4xbf16>, vector<8x4xf32> -> vector<8x4xf32>
    %c0_49 = arith.constant 0 : index
    %c0_50 = arith.constant 0 : index
    %57 = vector.load %arg11[%c0_49, %c0_50] : memref<1x4xf32, #tpu.memory_space<vmem>>, vector<1x4xf32>
    %58 = vector.broadcast %57 : vector<1x4xf32> to vector<8x4xf32>
    %59 = arith.addf %56, %58 : vector<8x4xf32>
    %cst_51 = arith.constant 0.000000e+00 : f32
    %60 = vector.broadcast %cst_51 : f32 to vector<8x4xf32>
    %61 = arith.maximumf %59, %60 : vector<8x4xf32>
    %62 = arith.truncf %61 : vector<8x4xf32> to vector<8x4xbf16>
    %c0_52 = arith.constant 0 : index
    %c0_53 = arith.constant 0 : index
    %c0_54 = arith.constant 0 : index
    %63 = vector.load %arg14[%c0_52, %c0_53, %c0_54] : memref<3x4x128xbf16, #tpu.memory_space<vmem>>, vector<1x4x128xbf16>
    %64 = vector.shape_cast %63 : vector<1x4x128xbf16> to vector<4x128xbf16>
    %cst_55 = arith.constant dense<0.000000e+00> : vector<8x128xf32>
    %65 = tpu.matmul %62, %64, %cst_55 {dimension_numbers = #tpu.dot_dimension_numbers<[1], [0], [0], [1], [0, 0, 1, 1], [], []>} : vector<8x4xbf16>, vector<4x128xbf16>, vector<8x128xf32> -> vector<8x128xf32>
    %66 = vector.extract_strided_slice %65 {offsets = [0, 0], sizes = [1, 128], strides = [1, 1]} : vector<8x128xf32> to vector<1x128xf32>
    %c1_56 = arith.constant 1 : index
    %c0_57 = arith.constant 0 : index
    %c0_58 = arith.constant 0 : index
    %67 = vector.load %arg14[%c1_56, %c0_57, %c0_58] : memref<3x4x128xbf16, #tpu.memory_space<vmem>>, vector<1x4x128xbf16>
    %68 = vector.shape_cast %67 : vector<1x4x128xbf16> to vector<4x128xbf16>
    %cst_59 = arith.constant dense<0.000000e+00> : vector<8x128xf32>
    %69 = tpu.matmul %62, %68, %cst_59 {dimension_numbers = #tpu.dot_dimension_numbers<[1], [0], [0], [1], [0, 0, 1, 1], [], []>} : vector<8x4xbf16>, vector<4x128xbf16>, vector<8x128xf32> -> vector<8x128xf32>
    %70 = vector.extract_strided_slice %69 {offsets = [0, 0], sizes = [1, 128], strides = [1, 1]} : vector<8x128xf32> to vector<1x128xf32>
    %c2_60 = arith.constant 2 : index
    %c0_61 = arith.constant 0 : index
    %c0_62 = arith.constant 0 : index
    %71 = vector.load %arg14[%c2_60, %c0_61, %c0_62] : memref<3x4x128xbf16, #tpu.memory_space<vmem>>, vector<1x4x128xbf16>
    %72 = vector.shape_cast %71 : vector<1x4x128xbf16> to vector<4x128xbf16>
    %cst_63 = arith.constant dense<0.000000e+00> : vector<8x128xf32>
    %73 = tpu.matmul %62, %72, %cst_63 {dimension_numbers = #tpu.dot_dimension_numbers<[1], [0], [0], [1], [0, 0, 1, 1], [], []>} : vector<8x4xbf16>, vector<4x128xbf16>, vector<8x128xf32> -> vector<8x128xf32>
    %74 = vector.extract_strided_slice %73 {offsets = [0, 0], sizes = [1, 128], strides = [1, 1]} : vector<8x128xf32> to vector<1x128xf32>
    %75 = tpu.iota {dimensions = array<i32: 0>} : vector<16x128xi32>
    %c0_i32 = arith.constant 0 : i32
    %76 = vector.broadcast %c0_i32 : i32 to vector<16x128xi32>
    %77 = arith.cmpi eq, %75, %76 : vector<16x128xi32>
    %78 = vector.shape_cast %66 : vector<1x128xf32> to vector<1x128xf32>
    %79 = vector.broadcast %78 : vector<1x128xf32> to vector<16x128xf32>
    %c15_i32 = arith.constant 15 : i32
    %80 = vector.broadcast %c15_i32 : i32 to vector<16x128xi32>
    %81 = arith.cmpi eq, %75, %80 : vector<16x128xi32>
    %82 = vector.shape_cast %74 : vector<1x128xf32> to vector<1x128xf32>
    %83 = vector.broadcast %82 : vector<1x128xf32> to vector<16x128xf32>
    %84 = vector.shape_cast %70 : vector<1x128xf32> to vector<1x128xf32>
    %85 = vector.broadcast %84 : vector<1x128xf32> to vector<16x128xf32>
    %86 = arith.select %81, %83, %85 : vector<16x128xi1>, vector<16x128xf32>
    %87 = arith.select %77, %79, %86 : vector<16x128xi1>, vector<16x128xf32>
    %c0_64 = arith.constant 0 : index
    %c0_65 = arith.constant 0 : index
    %88 = vector.load %arg18[%c0_64, %c0_65] : memref<18x64xf32, #tpu.memory_space<vmem>>, vector<16x64xf32>
    %89 = arith.truncf %88 : vector<16x64xf32> to vector<16x64xbf16>
    %c0_66 = arith.constant 0 : index
    %c0_67 = arith.constant 0 : index
    %c0_68 = arith.constant 0 : index
    %90 = vector.load %arg4[%c0_66, %c0_67, %c0_68] : memref<3x64x64xbf16, #tpu.memory_space<vmem>>, vector<1x64x64xbf16>
    %91 = vector.shape_cast %90 : vector<1x64x64xbf16> to vector<64x64xbf16>
    %cst_69 = arith.constant dense<0.000000e+00> : vector<16x64xf32>
    %92 = tpu.matmul %89, %91, %cst_69 {dimension_numbers = #tpu.dot_dimension_numbers<[1], [0], [0], [1], [0, 0, 1, 1], [], []>} : vector<16x64xbf16>, vector<64x64xbf16>, vector<16x64xf32> -> vector<16x64xf32>
    %c1_70 = arith.constant 1 : index
    %c0_71 = arith.constant 0 : index
    %93 = vector.load %arg18[%c1_70, %c0_71] : memref<18x64xf32, #tpu.memory_space<vmem>>, vector<16x64xf32>
    %94 = arith.truncf %93 : vector<16x64xf32> to vector<16x64xbf16>
    %c1_72 = arith.constant 1 : index
    %c0_73 = arith.constant 0 : index
    %c0_74 = arith.constant 0 : index
    %95 = vector.load %arg4[%c1_72, %c0_73, %c0_74] : memref<3x64x64xbf16, #tpu.memory_space<vmem>>, vector<1x64x64xbf16>
    %96 = vector.shape_cast %95 : vector<1x64x64xbf16> to vector<64x64xbf16>
    %cst_75 = arith.constant dense<0.000000e+00> : vector<16x64xf32>
    %97 = tpu.matmul %94, %96, %cst_75 {dimension_numbers = #tpu.dot_dimension_numbers<[1], [0], [0], [1], [0, 0, 1, 1], [], []>} : vector<16x64xbf16>, vector<64x64xbf16>, vector<16x64xf32> -> vector<16x64xf32>
    %98 = arith.addf %92, %97 : vector<16x64xf32>
    %c2_76 = arith.constant 2 : index
    %c0_77 = arith.constant 0 : index
    %99 = vector.load %arg18[%c2_76, %c0_77] : memref<18x64xf32, #tpu.memory_space<vmem>>, vector<16x64xf32>
    %100 = arith.truncf %99 : vector<16x64xf32> to vector<16x64xbf16>
    %c2_78 = arith.constant 2 : index
    %c0_79 = arith.constant 0 : index
    %c0_80 = arith.constant 0 : index
    %101 = vector.load %arg4[%c2_78, %c0_79, %c0_80] : memref<3x64x64xbf16, #tpu.memory_space<vmem>>, vector<1x64x64xbf16>
    %102 = vector.shape_cast %101 : vector<1x64x64xbf16> to vector<64x64xbf16>
    %cst_81 = arith.constant dense<0.000000e+00> : vector<16x64xf32>
    %103 = tpu.matmul %100, %102, %cst_81 {dimension_numbers = #tpu.dot_dimension_numbers<[1], [0], [0], [1], [0, 0, 1, 1], [], []>} : vector<16x64xbf16>, vector<64x64xbf16>, vector<16x64xf32> -> vector<16x64xf32>
    %104 = arith.addf %98, %103 : vector<16x64xf32>
    %c0_82 = arith.constant 0 : index
    %c0_83 = arith.constant 0 : index
    %105 = vector.load %arg5[%c0_82, %c0_83] : memref<1x64xf32, #tpu.memory_space<vmem>>, vector<1x64xf32>
    %106 = vector.broadcast %105 : vector<1x64xf32> to vector<16x64xf32>
    %107 = arith.addf %104, %106 : vector<16x64xf32>
    %cst_84 = arith.constant 0.000000e+00 : f32
    %108 = vector.broadcast %cst_84 : f32 to vector<16x64xf32>
    %109 = arith.maximumf %107, %108 : vector<16x64xf32>
    %c1_85 = arith.constant 1 : index
    %c0_86 = arith.constant 0 : index
    %110 = vector.load %arg18[%c1_85, %c0_86] : memref<18x64xf32, #tpu.memory_space<vmem>>, vector<16x64xf32>
    tpu.vector_store %arg18[%c1_85, %c0_86], %109 {strides = array<i32>} : memref<18x64xf32, #tpu.memory_space<vmem>>, vector<16x64xf32>,
    %c0_87 = arith.constant 0 : index
    %c0_88 = arith.constant 0 : index
    %111 = vector.load %arg18[%c0_87, %c0_88] : memref<18x64xf32, #tpu.memory_space<vmem>>, vector<16x64xf32>
    %112 = arith.truncf %111 : vector<16x64xf32> to vector<16x64xbf16>
    %c0_89 = arith.constant 0 : index
    %c0_90 = arith.constant 0 : index
    %c0_91 = arith.constant 0 : index
    %113 = vector.load %arg6[%c0_89, %c0_90, %c0_91] : memref<3x64x64xbf16, #tpu.memory_space<vmem>>, vector<1x64x64xbf16>
    %114 = vector.shape_cast %113 : vector<1x64x64xbf16> to vector<64x64xbf16>
    %cst_92 = arith.constant dense<0.000000e+00> : vector<16x64xf32>
    %115 = tpu.matmul %112, %114, %cst_92 {dimension_numbers = #tpu.dot_dimension_numbers<[1], [0], [0], [1], [0, 0, 1, 1], [], []>} : vector<16x64xbf16>, vector<64x64xbf16>, vector<16x64xf32> -> vector<16x64xf32>
    %c1_93 = arith.constant 1 : index
    %c0_94 = arith.constant 0 : index
    %116 = vector.load %arg18[%c1_93, %c0_94] : memref<18x64xf32, #tpu.memory_space<vmem>>, vector<16x64xf32>
    %117 = arith.truncf %116 : vector<16x64xf32> to vector<16x64xbf16>
    %c1_95 = arith.constant 1 : index
    %c0_96 = arith.constant 0 : index
    %c0_97 = arith.constant 0 : index
    %118 = vector.load %arg6[%c1_95, %c0_96, %c0_97] : memref<3x64x64xbf16, #tpu.memory_space<vmem>>, vector<1x64x64xbf16>
    %119 = vector.shape_cast %118 : vector<1x64x64xbf16> to vector<64x64xbf16>
    %cst_98 = arith.constant dense<0.000000e+00> : vector<16x64xf32>
    %120 = tpu.matmul %117, %119, %cst_98 {dimension_numbers = #tpu.dot_dimension_numbers<[1], [0], [0], [1], [0, 0, 1, 1], [], []>} : vector<16x64xbf16>, vector<64x64xbf16>, vector<16x64xf32> -> vector<16x64xf32>
    %121 = arith.addf %115, %120 : vector<16x64xf32>
    %c2_99 = arith.constant 2 : index
    %c0_100 = arith.constant 0 : index
    %122 = vector.load %arg18[%c2_99, %c0_100] : memref<18x64xf32, #tpu.memory_space<vmem>>, vector<16x64xf32>
    %123 = arith.truncf %122 : vector<16x64xf32> to vector<16x64xbf16>
    %c2_101 = arith.constant 2 : index
    %c0_102 = arith.constant 0 : index
    %c0_103 = arith.constant 0 : index
    %124 = vector.load %arg6[%c2_101, %c0_102, %c0_103] : memref<3x64x64xbf16, #tpu.memory_space<vmem>>, vector<1x64x64xbf16>
    %125 = vector.shape_cast %124 : vector<1x64x64xbf16> to vector<64x64xbf16>
    %cst_104 = arith.constant dense<0.000000e+00> : vector<16x64xf32>
    %126 = tpu.matmul %123, %125, %cst_104 {dimension_numbers = #tpu.dot_dimension_numbers<[1], [0], [0], [1], [0, 0, 1, 1], [], []>} : vector<16x64xbf16>, vector<64x64xbf16>, vector<16x64xf32> -> vector<16x64xf32>
    %127 = arith.addf %121, %126 : vector<16x64xf32>
    %c0_105 = arith.constant 0 : index
    %c0_106 = arith.constant 0 : index
    %128 = vector.load %arg7[%c0_105, %c0_106] : memref<1x64xf32, #tpu.memory_space<vmem>>, vector<1x64xf32>
    %129 = vector.broadcast %128 : vector<1x64xf32> to vector<16x64xf32>
    %130 = arith.addf %127, %129 : vector<16x64xf32>
    %cst_107 = arith.constant 0.000000e+00 : f32
    %131 = vector.broadcast %cst_107 : f32 to vector<16x64xf32>
    %132 = arith.maximumf %130, %131 : vector<16x64xf32>
    %133 = arith.addf %8, %132 : vector<16x64xf32>
    %c1_108 = arith.constant 1 : index
    %c0_109 = arith.constant 0 : index
    %134 = vector.load %arg18[%c1_108, %c0_109] : memref<18x64xf32, #tpu.memory_space<vmem>>, vector<16x64xf32>
    tpu.vector_store %arg18[%c1_108, %c0_109], %44 {strides = array<i32>} : memref<18x64xf32, #tpu.memory_space<vmem>>, vector<16x64xf32>,
    %c0_110 = arith.constant 0 : index
    %c0_111 = arith.constant 0 : index
    %135 = vector.load %arg18[%c0_110, %c0_111] : memref<18x64xf32, #tpu.memory_space<vmem>>, vector<16x64xf32>
    %136 = arith.truncf %135 : vector<16x64xf32> to vector<16x64xbf16>
    %c0_112 = arith.constant 0 : index
    %c0_113 = arith.constant 0 : index
    %c0_114 = arith.constant 0 : index
    %137 = vector.load %arg12[%c0_112, %c0_113, %c0_114] : memref<3x64x128xbf16, #tpu.memory_space<vmem>>, vector<1x64x128xbf16>
    %138 = vector.shape_cast %137 : vector<1x64x128xbf16> to vector<64x128xbf16>
    %cst_115 = arith.constant dense<0.000000e+00> : vector<16x128xf32>
    %139 = tpu.matmul %136, %138, %cst_115 {dimension_numbers = #tpu.dot_dimension_numbers<[1], [0], [0], [1], [0, 0, 1, 1], [], []>} : vector<16x64xbf16>, vector<64x128xbf16>, vector<16x128xf32> -> vector<16x128xf32>
    %c1_116 = arith.constant 1 : index
    %c0_117 = arith.constant 0 : index
    %140 = vector.load %arg18[%c1_116, %c0_117] : memref<18x64xf32, #tpu.memory_space<vmem>>, vector<16x64xf32>
    %141 = arith.truncf %140 : vector<16x64xf32> to vector<16x64xbf16>
    %c1_118 = arith.constant 1 : index
    %c0_119 = arith.constant 0 : index
    %c0_120 = arith.constant 0 : index
    %142 = vector.load %arg12[%c1_118, %c0_119, %c0_120] : memref<3x64x128xbf16, #tpu.memory_space<vmem>>, vector<1x64x128xbf16>
    %143 = vector.shape_cast %142 : vector<1x64x128xbf16> to vector<64x128xbf16>
    %cst_121 = arith.constant dense<0.000000e+00> : vector<16x128xf32>
    %144 = tpu.matmul %141, %143, %cst_121 {dimension_numbers = #tpu.dot_dimension_numbers<[1], [0], [0], [1], [0, 0, 1, 1], [], []>} : vector<16x64xbf16>, vector<64x128xbf16>, vector<16x128xf32> -> vector<16x128xf32>
    %145 = arith.addf %139, %144 : vector<16x128xf32>
    %c2_122 = arith.constant 2 : index
    %c0_123 = arith.constant 0 : index
    %146 = vector.load %arg18[%c2_122, %c0_123] : memref<18x64xf32, #tpu.memory_space<vmem>>, vector<16x64xf32>
    %147 = arith.truncf %146 : vector<16x64xf32> to vector<16x64xbf16>
    %c2_124 = arith.constant 2 : index
    %c0_125 = arith.constant 0 : index
    %c0_126 = arith.constant 0 : index
    %148 = vector.load %arg12[%c2_124, %c0_125, %c0_126] : memref<3x64x128xbf16, #tpu.memory_space<vmem>>, vector<1x64x128xbf16>
    %149 = vector.shape_cast %148 : vector<1x64x128xbf16> to vector<64x128xbf16>
    %cst_127 = arith.constant dense<0.000000e+00> : vector<16x128xf32>
    %150 = tpu.matmul %147, %149, %cst_127 {dimension_numbers = #tpu.dot_dimension_numbers<[1], [0], [0], [1], [0, 0, 1, 1], [], []>} : vector<16x64xbf16>, vector<64x128xbf16>, vector<16x128xf32> -> vector<16x128xf32>
    %151 = arith.addf %145, %150 : vector<16x128xf32>
    %c1_128 = arith.constant 1 : index
    %c0_129 = arith.constant 0 : index
    %152 = vector.load %arg18[%c1_128, %c0_129] : memref<18x64xf32, #tpu.memory_space<vmem>>, vector<16x64xf32>
    tpu.vector_store %arg18[%c1_128, %c0_129], %133 {strides = array<i32>} : memref<18x64xf32, #tpu.memory_space<vmem>>, vector<16x64xf32>,
    %c0_130 = arith.constant 0 : index
    %c0_131 = arith.constant 0 : index
    %153 = vector.load %arg18[%c0_130, %c0_131] : memref<18x64xf32, #tpu.memory_space<vmem>>, vector<16x64xf32>
    %154 = arith.truncf %153 : vector<16x64xf32> to vector<16x64xbf16>
    %c0_132 = arith.constant 0 : index
    %c0_133 = arith.constant 0 : index
    %c0_134 = arith.constant 0 : index
    %155 = vector.load %arg13[%c0_132, %c0_133, %c0_134] : memref<3x64x128xbf16, #tpu.memory_space<vmem>>, vector<1x64x128xbf16>
    %156 = vector.shape_cast %155 : vector<1x64x128xbf16> to vector<64x128xbf16>
    %cst_135 = arith.constant dense<0.000000e+00> : vector<16x128xf32>
    %157 = tpu.matmul %154, %156, %cst_135 {dimension_numbers = #tpu.dot_dimension_numbers<[1], [0], [0], [1], [0, 0, 1, 1], [], []>} : vector<16x64xbf16>, vector<64x128xbf16>, vector<16x128xf32> -> vector<16x128xf32>
    %c1_136 = arith.constant 1 : index
    %c0_137 = arith.constant 0 : index
    %158 = vector.load %arg18[%c1_136, %c0_137] : memref<18x64xf32, #tpu.memory_space<vmem>>, vector<16x64xf32>
    %159 = arith.truncf %158 : vector<16x64xf32> to vector<16x64xbf16>
    %c1_138 = arith.constant 1 : index
    %c0_139 = arith.constant 0 : index
    %c0_140 = arith.constant 0 : index
    %160 = vector.load %arg13[%c1_138, %c0_139, %c0_140] : memref<3x64x128xbf16, #tpu.memory_space<vmem>>, vector<1x64x128xbf16>
    %161 = vector.shape_cast %160 : vector<1x64x128xbf16> to vector<64x128xbf16>
    %cst_141 = arith.constant dense<0.000000e+00> : vector<16x128xf32>
    %162 = tpu.matmul %159, %161, %cst_141 {dimension_numbers = #tpu.dot_dimension_numbers<[1], [0], [0], [1], [0, 0, 1, 1], [], []>} : vector<16x64xbf16>, vector<64x128xbf16>, vector<16x128xf32> -> vector<16x128xf32>
    %163 = arith.addf %157, %162 : vector<16x128xf32>
    %c2_142 = arith.constant 2 : index
    %c0_143 = arith.constant 0 : index
    %164 = vector.load %arg18[%c2_142, %c0_143] : memref<18x64xf32, #tpu.memory_space<vmem>>, vector<16x64xf32>
    %165 = arith.truncf %164 : vector<16x64xf32> to vector<16x64xbf16>
    %c2_144 = arith.constant 2 : index
    %c0_145 = arith.constant 0 : index
    %c0_146 = arith.constant 0 : index
    %166 = vector.load %arg13[%c2_144, %c0_145, %c0_146] : memref<3x64x128xbf16, #tpu.memory_space<vmem>>, vector<1x64x128xbf16>
    %167 = vector.shape_cast %166 : vector<1x64x128xbf16> to vector<64x128xbf16>
    %cst_147 = arith.constant dense<0.000000e+00> : vector<16x128xf32>
    %168 = tpu.matmul %165, %167, %cst_147 {dimension_numbers = #tpu.dot_dimension_numbers<[1], [0], [0], [1], [0, 0, 1, 1], [], []>} : vector<16x64xbf16>, vector<64x128xbf16>, vector<16x128xf32> -> vector<16x128xf32>
    %169 = arith.addf %163, %168 : vector<16x128xf32>
    %170 = arith.addf %151, %169 : vector<16x128xf32>
    %171 = arith.addf %170, %87 : vector<16x128xf32>
    %c0_148 = arith.constant 0 : index
    %c0_149 = arith.constant 0 : index
    %172 = vector.load %arg15[%c0_148, %c0_149] : memref<1x128xf32, #tpu.memory_space<vmem>>, vector<1x128xf32>
    %173 = vector.broadcast %172 : vector<1x128xf32> to vector<16x128xf32>
    %174 = arith.addf %171, %173 : vector<16x128xf32>
    %cst_150 = arith.constant 0.000000e+00 : f32
    %175 = vector.broadcast %cst_150 : f32 to vector<16x128xf32>
    %176 = arith.maximumf %174, %175 : vector<16x128xf32>
    %c0_151 = arith.constant 0 : index
    %c0_152 = arith.constant 0 : index
    %c0_153 = arith.constant 0 : index
    %177 = vector.load %arg17[%c0_151, %c0_152, %c0_153] : memref<1x16x128xf32, #tpu.memory_space<vmem>>, vector<1x16x128xf32>
    %178 = vector.shape_cast %177 : vector<1x16x128xf32> to vector<16x128xf32>
    %179 = vector.shape_cast %176 : vector<16x128xf32> to vector<1x16x128xf32>
    tpu.vector_store %arg17[%c0_151, %c0_152, %c0_153], %179 {strides = array<i32>} : memref<1x16x128xf32, #tpu.memory_space<vmem>>, vector<1x16x128xf32>,
    return
  }
  func.func @transform_0(%arg0: i32) -> (i32, i32, i32) {
    %c0_i32 = arith.constant 0 : i32
    %c0_i32_0 = arith.constant 0 : i32
    %c0_i32_1 = arith.constant 0 : i32
    return %arg0, %c0_i32, %c0_i32_0 : i32, i32, i32
  }
  func.func @transform_1(%arg0: i32) -> (i32, i32) {
    %c0_i32 = arith.constant 0 : i32
    %c0_i32_0 = arith.constant 0 : i32
    %c0_i32_1 = arith.constant 0 : i32
    return %c0_i32, %c0_i32_0 : i32, i32
  }
  func.func @transform_2(%arg0: i32) -> (i32, i32) {
    %c0_i32 = arith.constant 0 : i32
    %c0_i32_0 = arith.constant 0 : i32
    %c0_i32_1 = arith.constant 0 : i32
    return %c0_i32, %c0_i32_0 : i32, i32
  }
  func.func @transform_3(%arg0: i32) -> (i32, i32, i32) {
    %c0_i32 = arith.constant 0 : i32
    %c0_i32_0 = arith.constant 0 : i32
    %c0_i32_1 = arith.constant 0 : i32
    %c0_i32_2 = arith.constant 0 : i32
    return %c0_i32, %c0_i32_0, %c0_i32_1 : i32, i32, i32
  }
  func.func @transform_4(%arg0: i32) -> (i32, i32) {
    %c0_i32 = arith.constant 0 : i32
    %c0_i32_0 = arith.constant 0 : i32
    %c0_i32_1 = arith.constant 0 : i32
    return %c0_i32, %c0_i32_0 : i32, i32
  }
  func.func @transform_5(%arg0: i32) -> (i32, i32, i32) {
    %c0_i32 = arith.constant 0 : i32
    %c0_i32_0 = arith.constant 0 : i32
    %c0_i32_1 = arith.constant 0 : i32
    %c0_i32_2 = arith.constant 0 : i32
    return %c0_i32, %c0_i32_0, %c0_i32_1 : i32, i32, i32
  }
  func.func @transform_6(%arg0: i32) -> (i32, i32) {
    %c0_i32 = arith.constant 0 : i32
    %c0_i32_0 = arith.constant 0 : i32
    %c0_i32_1 = arith.constant 0 : i32
    return %c0_i32, %c0_i32_0 : i32, i32
  }
  func.func @transform_7(%arg0: i32) -> (i32, i32) {
    %c0_i32 = arith.constant 0 : i32
    %c0_i32_0 = arith.constant 0 : i32
    %c0_i32_1 = arith.constant 0 : i32
    return %c0_i32, %c0_i32_0 : i32, i32
  }
  func.func @transform_8(%arg0: i32) -> (i32, i32) {
    %c0_i32 = arith.constant 0 : i32
    %c0_i32_0 = arith.constant 0 : i32
    %c0_i32_1 = arith.constant 0 : i32
    return %c0_i32, %c0_i32_0 : i32, i32
  }
  func.func @transform_9(%arg0: i32) -> (i32, i32) {
    %c0_i32 = arith.constant 0 : i32
    %c0_i32_0 = arith.constant 0 : i32
    %c0_i32_1 = arith.constant 0 : i32
    return %c0_i32, %c0_i32_0 : i32, i32
  }
  func.func @transform_10(%arg0: i32) -> (i32, i32) {
    %c0_i32 = arith.constant 0 : i32
    %c0_i32_0 = arith.constant 0 : i32
    %c0_i32_1 = arith.constant 0 : i32
    return %c0_i32, %c0_i32_0 : i32, i32
  }
  func.func @transform_11(%arg0: i32) -> (i32, i32, i32) {
    %c0_i32 = arith.constant 0 : i32
    %c0_i32_0 = arith.constant 0 : i32
    %c0_i32_1 = arith.constant 0 : i32
    %c0_i32_2 = arith.constant 0 : i32
    return %c0_i32, %c0_i32_0, %c0_i32_1 : i32, i32, i32
  }
  func.func @transform_12(%arg0: i32) -> (i32, i32, i32) {
    %c0_i32 = arith.constant 0 : i32
    %c0_i32_0 = arith.constant 0 : i32
    %c0_i32_1 = arith.constant 0 : i32
    %c0_i32_2 = arith.constant 0 : i32
    return %c0_i32, %c0_i32_0, %c0_i32_1 : i32, i32, i32
  }
  func.func @transform_13(%arg0: i32) -> (i32, i32, i32) {
    %c0_i32 = arith.constant 0 : i32
    %c0_i32_0 = arith.constant 0 : i32
    %c0_i32_1 = arith.constant 0 : i32
    %c0_i32_2 = arith.constant 0 : i32
    return %c0_i32, %c0_i32_0, %c0_i32_1 : i32, i32, i32
  }
  func.func @transform_14(%arg0: i32) -> (i32, i32) {
    %c0_i32 = arith.constant 0 : i32
    %c0_i32_0 = arith.constant 0 : i32
    %c0_i32_1 = arith.constant 0 : i32
    return %c0_i32, %c0_i32_0 : i32, i32
  }
  func.func @transform_15(%arg0: i32) -> (i32, i32, i32) {
    %c0_i32 = arith.constant 0 : i32
    %c0_i32_0 = arith.constant 0 : i32
    %c0_i32_1 = arith.constant 0 : i32
    %c0_i32_2 = arith.constant 0 : i32
    return %c0_i32, %c0_i32_0, %c0_i32_1 : i32, i32, i32
  }
  func.func @transform_16(%arg0: i32) -> (i32, i32, i32) {
    %c0_i32 = arith.constant 0 : i32
    %c0_i32_0 = arith.constant 0 : i32
    %c0_i32_1 = arith.constant 0 : i32
    return %arg0, %c0_i32, %c0_i32_0 : i32, i32, i32
  }
}

</mosaic_0001>

<bundles_post_ra>
// kernel: lr_res_block_forward.1
= control target key start
LH: loop header
LB: loop body
LE: loop exit
PB: predicated region body
PF: predicated region fallthrough
CT: control target
= control target key end

     0   :  { %s2246_s21 = smov 0   ;;  %s2611_s0 = inlined_call_operand.vmem [shape: bf16[2,16,128], index: 0, kind: input, shape index: {}]   ;;  %s2612_s1 = inlined_call_operand.vmem [shape: bf16[128,64], index: 1, kind: input, shape index: {}]   ;;  %s2613_s2 = inlined_call_operand.vmem [shape: f32[1,64], index: 2, kind: input, shape index: {}]   ;;  %s2614_s3 = inlined_call_operand.vmem [shape: bf16[3,64,64], index: 3, kind: input, shape index: {}]   ;;  %s2615_s4 = inlined_call_operand.vmem [shape: f32[1,64], index: 4, kind: input, shape index: {}]   ;;  %s2616_s5 = inlined_call_operand.vmem [shape: bf16[3,64,64], index: 5, kind: input, shape index: {}]   ;;  %s2617_s6 = inlined_call_operand.vmem [shape: f32[1,64], index: 6, kind: input, shape index: {}]   ;;  %s2618_s7 = inlined_call_operand.vmem [shape: bf16[64,4], index: 7, kind: input, shape index: {}]   ;;  %s2619_s8 = inlined_call_operand.vmem [shape: f32[1,4], index: 8, kind: input, shape index: {}]   ;;  %s2620_s9 = inlined_call_operand.vmem [shape: bf16[4,4], index: 9, kind: input, shape index: {}]   ;;  %s2621_s10 = inlined_call_operand.vmem [shape: f32[1,4], index: 10, kind: input, shape index: {}]   ;;  %s2622_s11 = inlined_call_operand.vmem [shape: bf16[3,64,128], index: 11, kind: input, shape index: {}]   ;;  %s2623_s12 = inlined_call_operand.vmem [shape: bf16[3,64,128], index: 12, kind: input, shape index: {}]   ;;  %s2624_s13 = inlined_call_operand.vmem [shape: bf16[3,4,128], index: 13, kind: input, shape index: {}]   ;;  %s2625_s14 = inlined_call_operand.vmem [shape: f32[1,128], index: 14, kind: input, shape index: {}]   ;;  %s2626_s15 = inlined_call_operand.vmem [shape: bf16[2,64,64], index: 15, kind: input, shape index: {}]   ;;  %s2627_s16 = inlined_call_operand.vmem [shape: f32[2,16,128], index: 16, kind: output, shape index: {}]  }
   0x1   :  { %2628 = sst [smem:[#allocation3_spill]] %s2611_s0 }
   0x2 LB: > { %s1683_s22 = sadd.s32 4294967295, %s2158_s21   ;;  %p1687_p0 = scmp.ge.s32.totalorder %s2158_s21, 1  ;;  %s2158_s21 = sphi %s2246_s21, %s26_s21  }
   0x3   : > { %p462_p1 = scmp.lt.s32.totalorder %s2158_s21, 3 }
   0x5   : > { %p463_p2 = pnand %p1687_p0, %p462_p1 }
   0x6   : > { %p512_p3 = scmp.lt.s32.totalorder (!%p463_p2), %s1683_s22, 1  ;;  %s2629_s29 = sld [smem:[#allocation3_spill]] (!%p463_p2) }
   0x7   : > { %466 = sbr.rel (%p463_p2) target bundleno = 959 (0x3bf), region = 84 }
   0xc   : > { %v2077_v0 = vld [vmem:[%s2612_s1 + $0x38] sm:$0xff]  ;;  %v2076_v1 = vld [vmem:[%s2612_s1 + $0x30] sm:$0xff]  ;;  %v2075_v2 = vld [vmem:[%s2612_s1 + $0x28] sm:$0xff]  ;;  %s2631_s22 = smov (!%p512_p3, %s1683_s22), 1  ;;  %vm615_vm0 = vcmask 523264   ;;  %v2160_v11 = vmov 0.0  }
   0xd   : > { %599 = vmatpush.bf16.msra.mxu0 %v2077_v0  ;;  %v2074_v3 = vld [vmem:[%s2612_s1 + $0x20] sm:$0xff]  ;;  %v2073_v4 = vld [vmem:[%s2612_s1 + $0x18] sm:$0xff]  ;;  %v2072_v5 = vld [vmem:[%s2612_s1 + $0x10] sm:$0xff]  ;;  %s2067_s24 = sshll.u32 %s2631_s22, 3  ;;  %616 = vst.msk [vmem:[#allocation2] sm:$0xff] %vm615_vm0, %v2160_v11  ;;  %vm618_vm1 = vcmask 517120  }
   0xe   : > { %v2071_v6 = vld [vmem:[%s2612_s1 + $0x8] sm:$0xff]  ;;  %v2070_v7 = vld [vmem:[%s2612_s1] sm:$0xff]  ;;  %s516_s30 = scalar_lea.vmem %s2629_s29, %s2067_s24  ;;  %v2089_v8 = vld [vmem:[%s2618_s7 + $0x18] sm:$0xff]  ;;  %617 = vst.msk [vmem:[#allocation2 + $0x8] sm:$0xff] %vm615_vm0, %v2160_v11  ;;  %vm879_vm2 = vcmask 1041408   ;;  %vm857_vm3 = vcmask 31744  }
   0xf   : > { %v2069_v9 = vld [vmem:[%s516_s30] sm:$0xff]  ;;  %v2088_v10 = vld [vmem:[%s2618_s7 + $0x10] sm:$0xff]  ;;  %v2087_v12 = vld [vmem:[%s2618_s7 + $0x8] sm:$0xff]  ;;  %619 = vst.msk [vmem:[#allocation2 + $0x10] sm:$0x3] %vm618_vm1, %v2160_v11  ;;  %s2068_s28 = sshll.u32 %s2631_s22, 4 }
  0x10   : > { %v2081_v13 = vld [vmem:[%s2626_s15 + $0x18] sm:$0xff]  ;;  %v2086_v15 = vld [vmem:[%s2618_s7] sm:$0xff]  ;;  %v2080_v16 = vld [vmem:[%s2626_s15 + $0x10] sm:$0xff]  ;;  %s521_s0 = scalar_lea.vmem %s2627_s16, %s2068_s28 }
  0x11   : > { %600 = vmatpush.bf16.msra.mxu0 %v2076_v1  ;;  %v2085_v14 = vld [vmem:[%s2626_s15 + $0x38] sm:$0xff]  ;;  %664 = vmatpush.bf16.msra.mxu1 %v2081_v13  ;;  %v2084_v17 = vld [vmem:[%s2626_s15 + $0x30] sm:$0xff]  ;;  %v2079_v18 = vld [vmem:[%s2626_s15 + $0x8] sm:$0xff] }
  0x12   : > { %711 = vmatpush.bf16.msra.mxu2 %v2085_v14  ;;  %737 = vmatpush.bf16.msra.mxu3 %v2081_v13  ;;  %v2083_v19 = vld [vmem:[%s2626_s15 + $0x28] sm:$0xff]  ;;  %v2078_v20 = vld [vmem:[%s2626_s15] sm:$0xff]  ;;  %v2097_v41 = vld [vmem:[%s2614_s3 + $0x38] sm:$0xff] }
  0x13   : > { %v2082_v21 = vld [vmem:[%s2626_s15 + $0x20] sm:$0xff]  ;;  %v2096_v43 = vld [vmem:[%s2614_s3 + $0x30] sm:$0xff]  ;;  %v2095_v44 = vld [vmem:[%s2614_s3 + $0x28] sm:$0xff] }
  0x14   : > { %v2147_v22 = vld [vmem:[%s2613_s2] ss:$0 sm:$0xff]  ;;  %v1793_v54 = vld [vmem:[%s2624_s13 + $0x2] sm:$0x3]  ;;  %v1795_v11 = vld [vmem:[%s2624_s13 + $0x4] sm:$0x3] }
  0x15   : > { %601 = vmatpush.bf16.msra.mxu0 %v2075_v2  ;;  %665 = vmatpush.bf16.msra.mxu1 %v2080_v16  ;;  %v871_v39 = vld [vmem:[%s2620_s9] sm:$0x3]  ;;  %v921_v56 = vsel %vm879_vm2, %v1793_v54, 0 }
  0x16   : > { %712 = vmatpush.bf16.msra.mxu2 %v2084_v17  ;;  %738 = vmatpush.bf16.msra.mxu3 %v2080_v16  ;;  %v881_v40 = vsel %vm879_vm2, %v871_v39, 0  ;;  %v2094_v50 = vld [vmem:[%s2614_s3 + $0x20] sm:$0xff] }
  0x17   : > { %v898_v53 = vld [vmem:[%s2624_s13] sm:$0x3] }
  0x18   : > { %v903_v55 = vsel %vm879_vm2, %v898_v53, 0  ;;  %v867_v63 = vld [vmem:[%s2619_s8] sm:$0x1] }
  0x19   : > { %602 = vmatpush.bf16.msra.mxu0 %v2074_v3  ;;  %666 = vmatpush.bf16.msra.mxu1 %v2079_v18 }
  0x1a   : > { %713 = vmatpush.bf16.msra.mxu2 %v2083_v19  ;;  %739 = vmatpush.bf16.msra.mxu3 %v2079_v18 }
  0x1d   : > { %603 = vmatpush.bf16.msra.mxu0 %v2073_v4  ;;  %667 = vmatpush.bf16.msra.mxu1 %v2078_v20 }
  0x1e   : > { %714 = vmatpush.bf16.msra.mxu2 %v2082_v21  ;;  %740 = vmatpush.bf16.msra.mxu3 %v2078_v20 }
  0x21   : > { %604 = vmatpush.bf16.msra.mxu0 %v2072_v5  ;;  %751 = vmatpush.bf16.msrb.mxu1 %v2085_v14 }
  0x22   : > { %777 = vmatpush.bf16.msrb.mxu2 %v2081_v13  ;;  %791 = vmatpush.bf16.msrb.mxu3 %v2085_v14  ;;  %v2093_v13 = vld [vmem:[%s2614_s3 + $0x18] sm:$0xff] }
  0x23   : > { %v2101_v14 = vld [vmem:[%s2614_s3 + $0x58] sm:$0xff] }
  0x25   : > { %605 = vmatpush.bf16.msra.mxu0 %v2071_v6  ;;  %752 = vmatpush.bf16.msrb.mxu1 %v2084_v17 }
  0x26   : > { %778 = vmatpush.bf16.msrb.mxu2 %v2080_v16  ;;  %792 = vmatpush.bf16.msrb.mxu3 %v2084_v17  ;;  %v2100_v16 = vld [vmem:[%s2614_s3 + $0x50] sm:$0xff]  ;;  %v2091_v17 = vld [vmem:[%s2614_s3 + $0x8] sm:$0xff] }
  0x29   : > { %606 = vmatpush.bf16.msra.mxu0 %v2070_v7  ;;  %753 = vmatpush.bf16.msrb.mxu1 %v2083_v19 }
  0x2a   : > { %779 = vmatpush.bf16.msrb.mxu2 %v2079_v18  ;;  %793 = vmatpush.bf16.msrb.mxu3 %v2083_v19  ;;  %v2099_v18 = vld [vmem:[%s2614_s3 + $0x48] sm:$0xff]  ;;  %v2090_v19 = vld [vmem:[%s2614_s3] sm:$0xff] }
  0x2c   : > { %607 = vmatmul.bf16.vlgmr.msra.gmra.mxu0 %v2069_v9 }
  0x2d   : > { %847 = vmatpush.bf16.msrb.mxu0 %v2089_v8  ;;  %754 = vmatpush.bf16.msrb.mxu1 %v2082_v21 }
  0x2e   : > { %780 = vmatpush.bf16.msrb.mxu2 %v2078_v20  ;;  %794 = vmatpush.bf16.msrb.mxu3 %v2082_v21  ;;  %v2098_v20 = vld [vmem:[%s2614_s3 + $0x40] sm:$0xff] }
  0x31   : > { %848 = vmatpush.bf16.msrb.mxu0 %v2088_v10 }
  0x35   : > { %849 = vmatpush.bf16.msrb.mxu0 %v2087_v12  ;;  %v939_v12 = vsel %vm879_vm2, %v1795_v11, 0 }
  0x39   : > { %850 = vmatpush.bf16.msrb.mxu0 %v2086_v15  ;;  %v2092_v15 = vld [vmem:[%s2614_s3 + $0x10] sm:$0xff] }
  0x3d   : > { %948 = vmatpush.bf16.msra.mxu0 %v939_v12  ;;  %v2124_v12 = vld [vmem:[%s2622_s11 + $0x50] sm:$0xff] }
  0xa9   : > { %v608_v23 = vpop.f32.mrf.mxu0 }
  0xaa   : > { %v609_v24 = vadd.f32 %v2147_v22, %v608_v23 }
  0xac   : > { %v2325_v25 = vmax.f32 %v609_v24, 0.0 }
  0xae   : > { %620 = vst.msk [vmem:[#allocation2 + $0x1] sm:$0xff] %vm615_vm0, %v2325_v25 }
  0xb1   : > { %v610_v26 = vpop.f32.mrf.mxu0 }
  0xb2   : > { %v611_v27 = vadd.f32 %v2147_v22, %v610_v26  ;;  %v2148_v22 = vld [vmem:[%s2621_s10] ss:$0 sm:$0xff] }
  0xb4   : > { %v2329_v28 = vmax.f32 %v611_v27, 0.0 }
  0xb5   : > { %v622_v30 = vld [vmem:[#allocation2] sm:$0xff] }
  0xb6   : > { %621 = vst.msk [vmem:[#allocation2 + $0x9] sm:$0xff] %vm615_vm0, %v2329_v28  ;;  %v807_v29 = vpack.c.bf16 %v2329_v28, %v2325_v25  ;;  %v727_v32 = vld [vmem:[#allocation2 + $0x1] sm:$0xff] }
  0xb8   : > { %1790 = vmatmul.msk.bf16.vlgmr.msrb.gmra.mxu0 %vm615_vm0, %v807_v29 }
  0xbd   : > { %v2336_v31 = vld [vmem:[#allocation2 + $0x8] sm:$0xff] }
  0xbe   : > { %v2338_v33 = vld [vmem:[#allocation2 + $0x9] sm:$0xff]  ;;  %v2341_v34 = vpack.c.bf16 %v2336_v31, %v622_v30 }
  0xbf   : > { %v729_v35 = vpack.c.bf16 %v2338_v33, %v727_v32  ;;  %v2349_v36 = vld [vmem:[#allocation2 + $0x2] sm:$0xff]  ;;  %v2351_v37 = vld [vmem:[#allocation2 + $0xa] sm:$0xff] }
  0xc0   : > { %1744 = vmatmul.msk.bf16.vlgmr.msra.gmra.mxu1 %vm615_vm0, %v2341_v34  ;;  %1769 = vmatmul.msk.bf16.vlgmr.msra.gmra.mxu2 %vm615_vm0, %v2341_v34  ;;  %v2355_v38 = vpack.c.bf16 %v2351_v37, %v2349_v36 }
  0xc1   : > { %1770 = vmatmul.msk.bf16.vlgmr.msra.gmra.mxu3 %vm615_vm0, %v729_v35  ;;  %890 = vmatpush.bf16.msra.mxu1 %v881_v40  ;;  %v954_v40 = vlaneseq }
  0xc2   : > { %912 = vmatpush.bf16.msra.mxu2 %v903_v55  ;;  %930 = vmatpush.bf16.msra.mxu3 %v921_v56  ;;  %v2111_v55 = vld [vmem:[%s2616_s5 + $0x48] sm:$0xff] }
  0xc3   : > { %v2107_v56 = vld [vmem:[%s2616_s5 + $0x28] sm:$0xff] }
  0xd0   : > { %1771 = vmatmul.msk.bf16.vlgmr.msrb.gmra.mxu1 %vm615_vm0, %v729_v35  ;;  %1772 = vmatmul.msk.bf16.vlgmr.msrb.gmra.mxu2 %vm615_vm0, %v2355_v38 }
  0xd1   : > { %1773 = vmatmul.msk.bf16.vlgmr.msrb.gmra.mxu3 %vm615_vm0, %v2355_v38  ;;  %1013 = vmatpush.bf16.msrb.mxu1 %v2097_v41 }
  0xd2   : > { %1051 = vmatpush.bf16.msrb.mxu2 %v2093_v13  ;;  %1098 = vmatpush.bf16.msrb.mxu3 %v2101_v14 }
  0xd5   : > { %1014 = vmatpush.bf16.msrb.mxu1 %v2096_v43  ;;  %v955_v43 = vshrl.u32 %v954_v40, 7 }
  0xd6   : > { %1052 = vmatpush.bf16.msrb.mxu2 %v2092_v15  ;;  %1099 = vmatpush.bf16.msrb.mxu3 %v2100_v16  ;;  %v2149_v16 = vld [vmem:[%s2615_s4] ss:$0 sm:$0xff] }
  0xd7   : > { %vm957_vm4 = vcmp.eq.s32.totalorder %v955_v43, 0 }
  0xd9   : > { %1015 = vmatpush.bf16.msrb.mxu1 %v2095_v44 }
  0xda   : > { %1053 = vmatpush.bf16.msrb.mxu2 %v2091_v17  ;;  %1100 = vmatpush.bf16.msrb.mxu3 %v2099_v18  ;;  %v2115_v18 = vld [vmem:[%s2622_s11 + $0x8] sm:$0xff] }
  0xdd   : > { %1016 = vmatpush.bf16.msrb.mxu1 %v2094_v50 }
  0xde   : > { %1054 = vmatpush.bf16.msrb.mxu2 %v2090_v19  ;;  %1101 = vmatpush.bf16.msrb.mxu3 %v2098_v20  ;;  %v2123_v19 = vld [vmem:[%s2622_s11 + $0x48] sm:$0xff] }
 0x135   : > { %v852_v42 = vpop.f32.mrf.mxu0 }
 0x136   : > { %v858_v47 = vsel %vm857_vm3, %v852_v42, 0.0 }
 0x13d   : > { %v669_v45 = vpop.f32.mrf.mxu1  ;;  %v854_v46 = vpop.f32.mrf.mxu0 }
 0x13e   : > { %v859_v48 = vsel %vm857_vm3, %v854_v46, 0.0  ;;  %v956_v46 = vadd.s32 8, %v955_v43 }
 0x13f   : > { %v860_v49 = vadd.f32 %v859_v48, %v858_v47  ;;  %v2112_v47 = vld [vmem:[%s2616_s5 + $0x50] sm:$0xff] }
 0x140   : > { %v2108_v48 = vld [vmem:[%s2616_s5 + $0x30] sm:$0xff]  ;;  %vm961_vm5 = vcmp.eq.s32.totalorder %v956_v46, 15 }
 0x141   : > { %v861_v51 = vrot.slane %v860_v49, 4 }
 0x143   : > { %v862_v52 = vadd.f32 %v861_v51, %v860_v49  ;;  %v716_v58 = vpop.f32.mrf.mxu2  ;;  %v2104_v49 = vld [vmem:[%s2616_s5 + $0x10] sm:$0xff] }
 0x144   : > { %v721_v61 = vmax.f32 %v669_v45, %v716_v58  ;;  %v742_v3 = vpop.f32.mrf.mxu3  ;;  %v2105_v45 = vld [vmem:[%s2616_s5 + $0x18] sm:$0xff] }
 0x145   : > { %v863_v57 = vrot.slane %v862_v52, 2  ;;  %v2388_v59 = vpop.f32.mrf.mxu1  ;;  %v2121_v58 = vld [vmem:[%s2622_s11 + $0x38] sm:$0xff] }
 0x146   : > { %v723_v1 = vmax.f32 %v622_v30, %v721_v61 }
 0x147   : > { %v864_v60 = vadd.f32 %v863_v57, %v862_v52  ;;  %v2103_v57 = vld [vmem:[%s2616_s5 + $0x8] sm:$0xff] }
 0x148   : > { %v725_v7 = vmax.f32 %v2325_v25, %v723_v1  ;;  %v2106_v1 = vld [vmem:[%s2616_s5 + $0x20] sm:$0xff] }
 0x149   : > { %v865_v62 = vrot.slane %v864_v60, 1 }
 0x14b   : > { %v866_v0 = vadd.f32 %v865_v62, %v864_v60  ;;  %v2438_v30 = vpop.f32.mrf.mxu2 }
 0x14d   : > { %v868_v2 = vadd.f32 %v867_v63, %v866_v0  ;;  %v756_v4 = vpop.f32.mrf.mxu1  ;;  %v2120_v63 = vld [vmem:[%s2622_s11 + $0x30] sm:$0xff]  ;;  %v2110_v0 = vld [vmem:[%s2616_s5 + $0x40] sm:$0xff] }
 0x14e   : > { %v761_v5 = vmax.f32 %v742_v3, %v756_v4 }
 0x14f   : > { %v869_v6 = vperm.slane %v868_v2, 0  ;;  %v2102_v2 = vld [vmem:[%s2616_s5] sm:$0xff] }
 0x150   : > { %v763_v8 = vmax.f32 %v727_v32, %v761_v5  ;;  %v2440_v32 = vpop.f32.mrf.mxu3  ;;  %v2119_v5 = vld [vmem:[%s2622_s11 + $0x28] sm:$0xff] }
 0x151   : > { %v870_v9 = vpack.c.bf16 %v869_v6, %v869_v6  ;;  %v2117_v6 = vld [vmem:[%s2622_s11 + $0x18] sm:$0xff] }
 0x152   : > { %v2394_v10 = vmax.f32 %v725_v7, %v763_v8  ;;  %v2125_v7 = vld [vmem:[%s2622_s11 + $0x58] sm:$0xff]  ;;  %v2118_v8 = vld [vmem:[%s2622_s11 + $0x20] sm:$0xff] }
 0x153   : > { %1791 = vmatmul.msk.bf16.vlgmr.msra.gmra.mxu1 %vm857_vm3, %v870_v9  ;;  %v2116_v9 = vld [vmem:[%s2622_s11 + $0x10] sm:$0xff] }
 0x154   : > { %1215 = vmatpush.bf16.msra.mxu1 %v2105_v45 }
 0x155   : > { %v2426_v21 = vpop.f32.mrf.mxu1 }
 0x158   : > { %v2444_v39 = vpop.f32.mrf.mxu3  ;;  %1216 = vmatpush.bf16.msra.mxu1 %v2104_v49 }
 0x15c   : > { %1217 = vmatpush.bf16.msra.mxu1 %v2103_v57 }
 0x160   : > { %v2448_v42 = vpop.f32.mrf.mxu3  ;;  %1218 = vmatpush.bf16.msra.mxu1 %v2102_v2  ;;  %v2137_v2 = vld [vmem:[%s2623_s12 + $0x58] sm:$0xff] }
 0x163   : > { %1821 = vmatmul.msk.bf16.vlgmr.msrb.gmra.mxu1 %vm615_vm0, %v729_v35  ;;  %v2442_v35 = vpop.f32.mrf.mxu2 }
 0x164   : > { %1440 = vmatpush.bf16.msrb.mxu1 %v2125_v7  ;;  %v801_v45 = vmax.f32 %v2442_v35, %v2444_v39  ;;  %v2127_v7 = vld [vmem:[%s2623_s12 + $0x8] sm:$0xff] }
 0x168   : > { %1441 = vmatpush.bf16.msrb.mxu1 %v2124_v12  ;;  %v2134_v12 = vld [vmem:[%s2623_s12 + $0x40] sm:$0xff] }
 0x16b   : > { %v2446_v41 = vpop.f32.mrf.mxu2 }
 0x16c   : > { %1442 = vmatpush.bf16.msrb.mxu1 %v2123_v19 }
 0x1d0   : > { %v892_v23 = vpop.f32.mrf.mxu1 }
 0x1d1   : > { %v893_v24 = vadd.f32 %v2148_v22, %v892_v23  ;;  %v2114_v22 = vld [vmem:[%s2622_s11] sm:$0xff] }
 0x1d2   : > { %v2122_v23 = vld [vmem:[%s2622_s11 + $0x40] sm:$0xff] }
 0x1d3   : > { %v896_v26 = vmax.f32 %v893_v24, 0.0  ;;  %1443 = vmatpush.bf16.msrb.mxu1 %v2122_v23 }
 0x1d5   : > { %v897_v27 = vpack.c.bf16 %v896_v26, %v896_v26 }
 0x1d7   : > { %1792 = vmatmul.msk.bf16.vlgmr.msra.gmra.mxu2 %vm857_vm3, %v897_v27  ;;  %1794 = vmatmul.msk.bf16.vlgmr.msra.gmra.mxu3 %vm857_vm3, %v897_v27 }
 0x1d8   : > { %1796 = vmatmul.msk.bf16.vlgmr.msra.gmra.mxu0 %vm857_vm3, %v897_v27  ;;  %v894_v29 = vpop.f32.mrf.mxu1  ;;  %1346 = vmatpush.bf16.msra.mxu3 %v2121_v58 }
 0x1dc   : > { %1347 = vmatpush.bf16.msra.mxu3 %v2120_v63 }
 0x1e0   : > { %1348 = vmatpush.bf16.msra.mxu3 %v2119_v5  ;;  %v1018_v11 = vpop.f32.mrf.mxu1  ;;  %v2136_v5 = vld [vmem:[%s2623_s12 + $0x50] sm:$0xff] }
 0x1e4   : > { %1349 = vmatpush.bf16.msra.mxu3 %v2118_v8  ;;  %v2135_v8 = vld [vmem:[%s2623_s12 + $0x48] sm:$0xff] }
 0x1e7   : > { %1838 = vmatmul.msk.bf16.vlgmr.msrb.gmra.mxu2 %vm615_vm0, %v2341_v34  ;;  %1863 = vmatmul.msk.bf16.vlgmr.msrb.gmra.mxu3 %vm615_vm0, %v2355_v38  ;;  %v2113_v34 = vld [vmem:[%s2616_s5 + $0x58] sm:$0xff] }
 0x1e8   : > { %v2109_v38 = vld [vmem:[%s2616_s5 + $0x38] sm:$0xff]  ;;  %1268 = vmatpush.bf16.msra.mxu2 %v2113_v34  ;;  %v1020_v26 = vpop.f32.mrf.mxu1 }
 0x1e9   : > { %1174 = vmatpush.bf16.msrb.mxu0 %v2109_v38  ;;  %v762_v38 = vmax.f32 %v2440_v32, %v2426_v21 }
 0x1eb   : > { %v764_v49 = vmax.f32 %v2338_v33, %v762_v38 }
 0x1ec   : > { %1269 = vmatpush.bf16.msra.mxu2 %v2112_v47 }
 0x1ed   : > { %1175 = vmatpush.bf16.msrb.mxu0 %v2108_v48  ;;  %v802_v48 = vmax.f32 %v2446_v41, %v2448_v42 }
 0x1f0   : > { %1270 = vmatpush.bf16.msra.mxu2 %v2111_v55 }
 0x1f1   : > { %1176 = vmatpush.bf16.msrb.mxu0 %v2107_v56 }
 0x1f4   : > { %1271 = vmatpush.bf16.msra.mxu2 %v2110_v0  ;;  %v2133_v0 = vld [vmem:[%s2623_s12 + $0x38] sm:$0xff] }
 0x1f5   : > { %1177 = vmatpush.bf16.msrb.mxu0 %v2106_v1  ;;  %v2129_v1 = vld [vmem:[%s2623_s12 + $0x18] sm:$0xff] }
 0x1f6   : > { %1549 = vmatpush.bf16.msrb.mxu3 %v2129_v1 }
 0x1f8   : > { %1508 = vmatpush.bf16.msrb.mxu2 %v2133_v0 }
 0x1f9   : > { %1387 = vmatpush.bf16.msra.mxu0 %v2117_v6  ;;  %v2131_v6 = vld [vmem:[%s2623_s12 + $0x28] sm:$0xff] }
 0x1fd   : > { %1388 = vmatpush.bf16.msra.mxu0 %v2116_v9  ;;  %v2130_v9 = vld [vmem:[%s2623_s12 + $0x20] sm:$0xff] }
 0x201   : > { %1389 = vmatpush.bf16.msra.mxu0 %v2115_v18 }
 0x205   : > { %1390 = vmatpush.bf16.msra.mxu0 %v2114_v22 }
 0x255   : > { %v950_v44 = vpop.f32.mrf.mxu0 }
 0x256   : > { %v962_v52 = vperm.slane %v950_v44, 0  ;;  %v722_v44 = vmax.f32 %v2388_v59, %v2438_v30  ;;  %v804_v30 = vmax.f32 %v2351_v37, %v802_v48 }
 0x258   : > { %v724_v47 = vmax.f32 %v2336_v31, %v722_v44 }
 0x25a   : > { %v914_v50 = vpop.f32.mrf.mxu2  ;;  %v932_v51 = vpop.f32.mrf.mxu3  ;;  %v726_v59 = vmax.f32 %v2329_v28, %v724_v47 }
 0x25b   : > { %v959_v53 = vperm.slane %v914_v50, 0  ;;  %v963_v54 = vperm.slane %v932_v51, 0  ;;  %v803_v50 = vmax.f32 %v2349_v36, %v801_v45 }
 0x25c   : > { %v766_v21 = vmax.f32 %v726_v59, %v764_v49 }
 0x25d   : > { %v2480_v60 = vsel %vm961_vm5, %v962_v52, %v963_v54  ;;  %v2482_v61 = vsel %vm957_vm4, %v959_v53, %v963_v54  ;;  %v952_v62 = vpop.f32.mrf.mxu0  ;;  %v805_v32 = vmax.f32 %v2394_v10, %v803_v50 }
 0x25e   : > { %v806_v51 = vmax.f32 %v766_v21, %v804_v30 }
 0x262   : > { %v916_v3 = vpop.f32.mrf.mxu2  ;;  %v934_v4 = vpop.f32.mrf.mxu3 }
 0x263   : > { %v2132_v3 = vld [vmem:[%s2623_s12 + $0x30] sm:$0xff] }
 0x264   : > { %v2128_v4 = vld [vmem:[%s2623_s12 + $0x10] sm:$0xff]  ;;  %1509 = vmatpush.bf16.msrb.mxu2 %v2132_v3 }
 0x265   : > { %1550 = vmatpush.bf16.msrb.mxu3 %v2128_v4 }
 0x268   : > { %1510 = vmatpush.bf16.msrb.mxu2 %v2131_v6 }
 0x269   : > { %1551 = vmatpush.bf16.msrb.mxu3 %v2127_v7 }
 0x26a   : > { %v1056_v13 = vpop.f32.mrf.mxu2  ;;  %v1103_v14 = vpop.f32.mrf.mxu3 }
 0x26b   : > { %v1057_v15 = vadd.f32 %v1056_v13, %v1018_v11  ;;  %v2126_v11 = vld [vmem:[%s2623_s12] sm:$0xff] }
 0x26c   : > { %1511 = vmatpush.bf16.msrb.mxu2 %v2130_v9 }
 0x26d   : > { %v1108_v17 = vadd.f32 %v1103_v14, %v1057_v15  ;;  %1552 = vmatpush.bf16.msrb.mxu3 %v2126_v11 }
 0x26f   : > { %v1114_v20 = vadd.f32 %v2149_v16, %v1108_v17 }
 0x271   : > { %v1116_v24 = vmax.f32 %v1114_v20, 0.0 }
 0x272   : > { %v1058_v27 = vpop.f32.mrf.mxu2  ;;  %v1105_v40 = vpop.f32.mrf.mxu3 }
 0x273   : > { %1118 = vst.msk [vmem:[#allocation2 + $0x1] sm:$0xff] %vm615_vm0, %v1116_v24  ;;  %v1059_v29 = vadd.f32 %v1058_v27, %v1020_v26 }
 0x275   : > { %v1109_v43 = vadd.f32 %v1105_v40, %v1059_v29 }
 0x277   : > { %v1115_v34 = vadd.f32 %v2149_v16, %v1109_v43  ;;  %v2150_v16 = vld [vmem:[%s2617_s6] ss:$0 sm:$0xff] }
 0x279   : > { %v1117_v46 = vmax.f32 %v1115_v34, 0.0 }
 0x27a   : > { %v1131_v35 = vld [vmem:[#allocation2 + $0x1] sm:$0xff] }
 0x27b   : > { %1119 = vst.msk [vmem:[#allocation2 + $0x9] sm:$0xff] %vm615_vm0, %v1117_v46  ;;  %v1120_v39 = vld [vmem:[#allocation2] sm:$0xff] }
 0x282   : > { %v1132_v31 = vld [vmem:[#allocation2 + $0x9] sm:$0xff] }
 0x283   : > { %v1121_v52 = vld [vmem:[#allocation2 + $0x8] sm:$0xff]  ;;  %v1133_v41 = vpack.c.bf16 %v1132_v31, %v1131_v35 }
 0x284   : > { %v1225_v53 = vld [vmem:[#allocation2 + $0x2] sm:$0xff]  ;;  %v1122_v42 = vpack.c.bf16 %v1121_v52, %v1120_v39  ;;  %v1226_v54 = vld [vmem:[#allocation2 + $0xa] sm:$0xff] }
 0x285   : > { %1290 = vst.msk [vmem:[#allocation2 + $0x1] sm:$0xff] %vm615_vm0, %v805_v32  ;;  %v1227_v33 = vpack.c.bf16 %v1226_v54, %v1225_v53  ;;  %1888 = vmatmul.msk.bf16.vlgmr.msrb.gmra.mxu0 %vm615_vm0, %v1133_v41  ;;  %v2151_v54 = vld [vmem:[%s2625_s14] ss:$0 sm:$0xff] }
 0x286   : > { %1291 = vst.msk [vmem:[#allocation2 + $0x9] sm:$0xff] %vm615_vm0, %v806_v51  ;;  %1905 = vmatmul.msk.bf16.vlgmr.msra.gmra.mxu1 %vm615_vm0, %v1122_v42  ;;  %1602 = vmatpush.bf16.msrb.mxu0 %v2137_v2 }
 0x287   : > { %1930 = vmatmul.msk.bf16.vlgmr.msra.gmra.mxu2 %vm615_vm0, %v1227_v33 }
 0x28a   : > { %1603 = vmatpush.bf16.msrb.mxu0 %v2136_v5 }
 0x28c   : > { %v1303_v36 = vld [vmem:[#allocation2 + $0x1] sm:$0xff] }
 0x28d   : > { %v1304_v37 = vld [vmem:[#allocation2 + $0x9] sm:$0xff]  ;;  %v1292_v55 = vld [vmem:[#allocation2] sm:$0xff] }
 0x28e   : > { %v1305_v10 = vpack.c.bf16 %v1304_v37, %v1303_v36  ;;  %v1293_v56 = vld [vmem:[#allocation2 + $0x8] sm:$0xff]  ;;  %1604 = vmatpush.bf16.msrb.mxu0 %v2135_v8 }
 0x28f   : > { %v1397_v57 = vld [vmem:[#allocation2 + $0x2] sm:$0xff]  ;;  %v1398_v58 = vld [vmem:[#allocation2 + $0xa] sm:$0xff]  ;;  %v1294_v62 = vpack.c.bf16 %v1293_v56, %v1292_v55 }
 0x290   : > { %1955 = vmatmul.msk.bf16.vlgmr.msra.gmra.mxu3 %vm615_vm0, %v1305_v10  ;;  %v1399_v63 = vpack.c.bf16 %v1398_v58, %v1397_v57 }
 0x292   : > { %1605 = vmatpush.bf16.msrb.mxu0 %v2134_v12 }
 0x295   : > { %1972 = vmatmul.msk.bf16.vlgmr.msra.gmra.mxu0 %vm615_vm0, %v1294_v62 }
 0x296   : > { %1997 = vmatmul.msk.bf16.vlgmr.msrb.gmra.mxu1 %vm615_vm0, %v1399_v63 }
 0x302   : > { %v1179_v13 = vpop.f32.mrf.mxu0 }
 0x303   : > { %v1220_v14 = vpop.f32.mrf.mxu1 }
 0x304   : > { %v1221_v15 = vadd.f32 %v1220_v14, %v1179_v13 }
 0x30a   : > { %v1273_v17 = vpop.f32.mrf.mxu2  ;;  %v1181_v20 = vpop.f32.mrf.mxu0 }
 0x30b   : > { %v1278_v18 = vadd.f32 %v1273_v17, %v1221_v15  ;;  %v1222_v22 = vpop.f32.mrf.mxu1 }
 0x30c   : > { %v1223_v26 = vadd.f32 %v1222_v22, %v1181_v20 }
 0x30d   : > { %v1284_v19 = vadd.f32 %v2150_v16, %v1278_v18 }
 0x30f   : > { %v1286_v23 = vmax.f32 %v1284_v19, 0.0 }
 0x311   : > { %v1288_v24 = vadd.f32 %v1286_v23, %v2325_v25 }
 0x312   : > { %v1275_v27 = vpop.f32.mrf.mxu2  ;;  %v1392_v59 = vpop.f32.mrf.mxu0 }
 0x313   : > { %1452 = vst.msk [vmem:[#allocation2 + $0x1] sm:$0xff] %vm615_vm0, %v1288_v24  ;;  %v1279_v29 = vadd.f32 %v1275_v27, %v1223_v26  ;;  %v1445_v35 = vpop.f32.mrf.mxu1 }
 0x315   : > { %v1285_v40 = vadd.f32 %v2150_v16, %v1279_v29 }
 0x317   : > { %v1287_v43 = vmax.f32 %v1285_v40, 0.0 }
 0x319   : > { %v1289_v44 = vadd.f32 %v1287_v43, %v2329_v28  ;;  %v1351_v28 = vpop.f32.mrf.mxu3 }
 0x31a   : > { %v1465_v34 = vld [vmem:[#allocation2 + $0x1] sm:$0xff]  ;;  %v1394_v30 = vpop.f32.mrf.mxu0  ;;  %v1393_v32 = vadd.f32 %v1392_v59, %v1351_v28 }
 0x31b   : > { %1453 = vst.msk [vmem:[#allocation2 + $0x9] sm:$0xff] %vm615_vm0, %v1289_v44  ;;  %v1454_v38 = vld [vmem:[#allocation2] sm:$0xff]  ;;  %v1447_v57 = vpop.f32.mrf.mxu1 }
 0x31c   : > { %v1450_v53 = vadd.f32 %v1445_v35, %v1393_v32 }
 0x321   : > { %v1353_v21 = vpop.f32.mrf.mxu3 }
 0x322   : > { %v1466_v45 = vld [vmem:[#allocation2 + $0x9] sm:$0xff]  ;;  %v1395_v33 = vadd.f32 %v1394_v30, %v1353_v21 }
 0x323   : > { %v1455_v46 = vld [vmem:[#allocation2 + $0x8] sm:$0xff]  ;;  %v1467_v48 = vpack.c.bf16 %v1466_v45, %v1465_v34 }
 0x324   : > { %v1559_v47 = vld [vmem:[#allocation2 + $0x2] sm:$0xff]  ;;  %v1456_v49 = vpack.c.bf16 %v1455_v46, %v1454_v38  ;;  %v1560_v50 = vld [vmem:[#allocation2 + $0xa] sm:$0xff]  ;;  %v1451_v62 = vadd.f32 %v1447_v57, %v1395_v33 }
 0x325   : > { %v1561_v25 = vpack.c.bf16 %v1560_v50, %v1559_v47  ;;  %2022 = vmatmul.msk.bf16.vlgmr.msrb.gmra.mxu2 %vm615_vm0, %v1467_v48 }
 0x326   : > { %2039 = vmatmul.msk.bf16.vlgmr.msrb.gmra.mxu3 %vm615_vm0, %v1456_v49 }
 0x327   : > { %2064 = vmatmul.msk.bf16.vlgmr.msrb.gmra.mxu0 %vm615_vm0, %v1561_v25 }
 0x3a4   : > { %v1607_v39 = vpop.f32.mrf.mxu0 }
 0x3a8   : > { %v1513_v51 = vpop.f32.mrf.mxu2 }
 0x3a9   : > { %v1554_v31 = vpop.f32.mrf.mxu3 }
 0x3aa   : > { %v1555_v52 = vadd.f32 %v1554_v31, %v1513_v51 }
 0x3ac   : > { %v1612_v41 = vadd.f32 %v1607_v39, %v1555_v52  ;;  %v1609_v58 = vpop.f32.mrf.mxu0 }
 0x3ae   : > { %v1614_v42 = vadd.f32 %v1612_v41, %v1450_v53 }
 0x3b0   : > { %v1616_v36 = vadd.f32 %v1614_v42, %v2482_v61  ;;  %v1515_v37 = vpop.f32.mrf.mxu2 }
 0x3b1   : > { %v1556_v10 = vpop.f32.mrf.mxu3 }
 0x3b2   : > { %v1622_v55 = vadd.f32 %v2151_v54, %v1616_v36  ;;  %v1557_v56 = vadd.f32 %v1556_v10, %v1515_v37 }
 0x3b4   : > { %v1624_v63 = vmax.f32 %v1622_v55, 0.0  ;;  %v1613_v0 = vadd.f32 %v1609_v58, %v1557_v56 }
 0x3b6   : > { %1626 = vst [vmem:[%s521_s0] sm:$0xff] %v1624_v63  ;;  %v1615_v1 = vadd.f32 %v1613_v0, %v1451_v62 }
 0x3b8   : > { %v1617_v2 = vadd.f32 %v1615_v1, %v2480_v60 }
 0x3ba   : > { %v1623_v3 = vadd.f32 %v2151_v54, %v1617_v2 }
 0x3bc   : > { %v1625_v4 = vmax.f32 %v1623_v3, 0.0 }
 0x3be   : > { %1627 = vst [vmem:[%s521_s0 + $0x8] sm:$0xff] %v1625_v4 }
 0x3bf PF: > { %s26_s21 = sadd.s32 1, %s2158_s21  }
 0x3c0   : > { %p23_p4 = scmp.ge.s32.totalorder %s26_s21, 4  }
 0x3c2   :  { %25 = sbr.rel (!%p23_p4) target bundleno = 2 (0x2), region = 125 }

</bundles_post_ra>
